<compile_context>
chip_gen: v7x
topology: tpu7x:2x2x1
jax: 0.10.0
libtpu: 0.0.40
codegen_flags: <defaults>
</compile_context>

<pallas_src>
import functools

import jax
import jax.numpy as jnp
from jax.experimental import pallas as pl
from jax.experimental.pallas import tpu as pltpu


DEC_H1 = 128  # dec_fc1 output width (fixed by the module definition)


def _ceil_div(a, b):
  return -(-a // b)


# ---------------------------------------------------------------------------
# Pallas kernel: full fused CVAE forward (one batch tile per grid step)
# ---------------------------------------------------------------------------
def cvae_kernel(
    # data (batch-tiled): packed [x | y_onehot | eps | pad] slab
    in_ref,
    # weights (resident across the grid; f32 or bf16)
    ew1_ref, ew2_ref, mulvw_ref, d1c_ref, dw2_ref, ow_ref,
    # packed per-feature vectors, f32, (4, 512):
    #   lanes   0:256 rows 0..3 -> enc scale1, enc shift1', dec scale2, dec shift2'
    #   lanes 256:384 rows 0..3 -> enc scale2, enc shift2', dec scale1, dec shift1'
    #   lanes 384:512 rows 0..2 -> [mu_b||lv_b | pad], [cls_b | pad], [out_b | pad]
    vecs_ref,
    # output: single lane-dense slab [recon | logits | mu | logvar | pad]
    out_ref,
    *, input_dim, latent_dim, num_classes,
):
  f32 = jnp.float32

  def mm(a, w_ref):
    # bf16 (or f32) MXU matmul with f32 accumulation.
    w = w_ref[...]
    return jnp.dot(a.astype(w.dtype), w, preferred_element_type=f32)

  data = in_ref[...]                                    # (rows, in_width) f32
  rows = data.shape[0]
  x = data[:, :input_dim]
  y = data[:, input_dim:input_dim + num_classes]
  eps = data[:, input_dim + num_classes:input_dim + num_classes + latent_dim]

  es1 = vecs_ref[0:1, 0:256]
  eh1 = vecs_ref[1:2, 0:256]
  ds2 = vecs_ref[2:3, 0:256]
  dh2 = vecs_ref[3:4, 0:256]
  es2 = vecs_ref[0:1, 256:384]
  eh2 = vecs_ref[1:2, 256:384]
  ds1 = vecs_ref[2:3, 256:384]
  dh1 = vecs_ref[3:4, 256:384]
  mulvb = vecs_ref[0:1, 384:384 + 2 * latent_dim]
  clsb = vecs_ref[1:2, 384:384 + num_classes]
  ob = vecs_ref[2:3, 384:384 + input_dim]

  # ---- encoder (fc bias folded into BN shift; dropout = identity) ---------
  h = jnp.maximum(mm(x, ew1_ref) * es1 + eh1, 0.0)
  h = jnp.maximum(mm(h, ew2_ref) * es2 + eh2, 0.0)

  # ---- fused mu || logvar projection ---------------------------------------
  mulv = mm(h, mulvw_ref) + mulvb
  mu = mulv[:, :latent_dim]
  logvar = mulv[:, latent_dim:2 * latent_dim]

  # ---- reparameterize (f32) -------------------------------------------------
  z = mu + eps * jnp.exp(0.5 * logvar)

  # ---- decoder fc1 + classifier fused into one matmul -----------------------
  zy = jnp.concatenate([z, y], axis=1)                  # (rows, latent+classes)
  d1c = mm(zy, d1c_ref)                                 # (rows, 128 + classes)
  logits = d1c[:, DEC_H1:DEC_H1 + num_classes] + clsb
  hd = jnp.maximum(d1c[:, :DEC_H1] * ds1 + dh1, 0.0)

  # ---- decoder fc2 / output -------------------------------------------------
  hd = jnp.maximum(mm(hd, dw2_ref) * ds2 + dh2, 0.0)
  recon = mm(hd, ow_ref) + ob

  # ---- single lane-dense output store ---------------------------------------
  used = input_dim + num_classes + 2 * latent_dim
  pad = out_ref.shape[-1] - used
  pieces = [recon, logits, mu, logvar]
  if pad > 0:
    pieces.append(jnp.zeros((rows, pad), f32))
  out_ref[...] = jnp.concatenate(pieces, axis=1).astype(out_ref.dtype)


# ---------------------------------------------------------------------------
# JAX wrapper: parameter folding / packing + pallas_call
# ---------------------------------------------------------------------------
def fold_bn_bias(bias, gamma, beta, mean, var, eps=1e-5):
  """Fold Linear bias + eval-mode BatchNorm1d into (scale, shift) vectors."""
  scale = gamma / jnp.sqrt(var + eps)
  shift = (bias - mean) * scale + beta
  return scale, shift


@functools.partial(
    jax.jit, static_argnames=("block_batch", "use_bf16_matmul", "out_dtype"))
def cvae_forward(x, y_onehot, eps, params, *, block_batch=None,
                 use_bf16_matmul=True, out_dtype=jnp.float32):
  f32 = jnp.float32
  B, input_dim = x.shape
  latent_dim = params["mu_w"].shape[1]
  num_classes = y_onehot.shape[1]

  # Batch tile: big tiles amortize per-grid-step overhead; keep >= 2 grid steps
  # when the batch allows it so the "parallel" axis shards across v7x's 2 TCs.
  # Cap at 512 so the per-step footprint stays inside v5e's 16 MiB scoped VMEM.
  if block_batch is None:
    if B <= 256:
      block_batch = B
    elif B <= 1024:
      block_batch = _ceil_div(B, 2)
    else:
      block_batch = 512
  block_batch = max(8, _ceil_div(block_batch, 8) * 8)
  B_pad = _ceil_div(B, block_batch) * block_batch
  grid = (B_pad // block_batch,)

  wt = jnp.bfloat16 if use_bf16_matmul else f32

  # ---- fold BN (eval mode) + fc bias into scale/shift, pack into one slab ---
  es1, eh1 = fold_bn_bias(params["enc_b1"], *params["enc_bn1"])
  es2, eh2 = fold_bn_bias(params["enc_b2"], *params["enc_bn2"])
  ds1, dh1 = fold_bn_bias(params["dec_b1"], *params["dec_bn1"])
  ds2, dh2 = fold_bn_bias(params["dec_b2"], *params["dec_bn2"])

  def pad_row(v, width=128):
    return jnp.zeros((width,), f32).at[:v.shape[0]].set(v)

  vecs = jnp.concatenate([
      jnp.stack([es1, eh1, ds2, dh2]),                         # (4, 256)
      jnp.stack([es2, eh2, ds1, dh1]),                         # (4, 128)
      jnp.stack([
          pad_row(jnp.concatenate([params["mu_b"], params["lv_b"]])),
          pad_row(params["cls_b"]),
          pad_row(params["out_b"]),
          jnp.zeros((128,), f32),
      ]),                                                      # (4, 128)
  ], axis=1)                                                   # (4, 512)

  # ---- fused projection weights (cast once to the matmul dtype) -------------
  mulv_w = jnp.concatenate([params["mu_w"], params["lv_w"]], axis=1).astype(wt)
  cls_w_pad = jnp.concatenate(
      [params["cls_w"], jnp.zeros((num_classes, num_classes), f32)], axis=0)
  d1c_w = jnp.concatenate([params["dec_w1"], cls_w_pad], axis=1).astype(wt)
  ew1 = params["enc_w1"].astype(wt)
  ew2 = params["enc_w2"].astype(wt)
  dw2 = params["dec_w2"].astype(wt)
  ow = params["out_w"].astype(wt)

  # ---- pack x || y || eps into one lane-dense input slab --------------------
  in_used = input_dim + num_classes + latent_dim
  in_width = _ceil_div(in_used, 128) * 128
  data = jnp.concatenate([x, y_onehot, eps], axis=1).astype(f32)
  data = jnp.pad(data, ((0, B_pad - B), (0, in_width - in_used)))

  out_used = input_dim + num_classes + 2 * latent_dim
  out_width = _ceil_div(out_used, 128) * 128

  kern = functools.partial(cvae_kernel, input_dim=input_dim,
                           latent_dim=latent_dim, num_classes=num_classes)

  def resident(arr):  # full-array block, constant index -> stays in VMEM
    return pl.BlockSpec(arr.shape, lambda i: (0, 0))

  operands = (data, ew1, ew2, mulv_w, d1c_w, dw2, ow, vecs)
  in_specs = [
      pl.BlockSpec((block_batch, in_width), lambda i: (i, 0)),
      resident(ew1), resident(ew2), resident(mulv_w),
      resident(d1c_w), resident(dw2), resident(ow), resident(vecs),
  ]

  out = pl.pallas_call(
      kern,
      grid=grid,
      in_specs=in_specs,
      out_specs=pl.BlockSpec((block_batch, out_width), lambda i: (i, 0)),
      out_shape=jax.ShapeDtypeStruct((B_pad, out_width), out_dtype),
      compiler_params=pltpu.CompilerParams(
          dimension_semantics=("parallel",)),
  )(*operands)

  o0 = input_dim
  o1 = o0 + num_classes
  o2 = o1 + latent_dim
  o3 = o2 + latent_dim
  return out[:B, :o0], out[:B, o0:o1], out[:B, o1:o2], out[:B, o2:o3]


# ---------------------------------------------------------------------------
# Deterministic synthetic parameters (shapes from CVAE.__init__)
# ---------------------------------------------------------------------------
def init_params(key, input_dim, latent_dim, num_classes):
  ks = iter(jax.random.split(key, 32))

  def lin(k, fan_in, fan_out):
    # weight stored (in, out) so the kernel does x @ W; equivalent to
    # PyTorch's x @ W.T with W of shape (out, in).
    lim = 1.0 / jnp.sqrt(fan_in)
    return jax.random.uniform(k, (fan_in, fan_out), jnp.float32, -lim, lim)

  def bias(k, n):
    return jax.random.uniform(k, (n,), jnp.float32, -0.1, 0.1)

  def bn(k, n):
    kg, kb, km, kv = jax.random.split(k, 4)
    gamma = 1.0 + 0.1 * jax.random.normal(kg, (n,), jnp.float32)
    beta = 0.1 * jax.random.normal(kb, (n,), jnp.float32)
    mean = 0.1 * jax.random.normal(km, (n,), jnp.float32)
    var = jnp.abs(1.0 + 0.1 * jax.random.normal(kv, (n,), jnp.float32))
    return (gamma, beta, mean, var)

  return {
      "enc_w1": lin(next(ks), input_dim, 256), "enc_b1": bias(next(ks), 256),
      "enc_bn1": bn(next(ks), 256),
      "enc_w2": lin(next(ks), 256, 128), "enc_b2": bias(next(ks), 128),
      "enc_bn2": bn(next(ks), 128),
      "mu_w": lin(next(ks), 128, latent_dim), "mu_b": bias(next(ks), latent_dim),
      "lv_w": lin(next(ks), 128, latent_dim), "lv_b": bias(next(ks), latent_dim),
      "cls_w": lin(next(ks), latent_dim, num_classes),
      "cls_b": bias(next(ks), num_classes),
      "dec_w1": lin(next(ks), latent_dim + num_classes, 128),
      "dec_b1": bias(next(ks), 128),
      "dec_bn1": bn(next(ks), 128),
      "dec_w2": lin(next(ks), 128, 256), "dec_b2": bias(next(ks), 256),
      "dec_bn2": bn(next(ks), 256),
      "out_w": lin(next(ks), 256, input_dim), "out_b": bias(next(ks), input_dim),
  }


# Pure-JAX reference for a correctness sanity check.
def cvae_ref(x, y_onehot, eps, params):
  def bn(h, bnp):
    g, b, m, v = bnp
    return g * (h - m) / jnp.sqrt(v + 1e-5) + b

  h = jax.nn.relu(bn(x @ params["enc_w1"] + params["enc_b1"], params["enc_bn1"]))
  h = jax.nn.relu(bn(h @ params["enc_w2"] + params["enc_b2"], params["enc_bn2"]))
  mu = h @ params["mu_w"] + params["mu_b"]
  logvar = h @ params["lv_w"] + params["lv_b"]
  z = mu + eps * jnp.exp(0.5 * logvar)
  logits = z @ params["cls_w"] + params["cls_b"]
  zc = jnp.concatenate([z, y_onehot], axis=1)
  hd = jax.nn.relu(bn(zc @ params["dec_w1"] + params["dec_b1"], params["dec_bn1"]))
  hd = jax.nn.relu(bn(hd @ params["dec_w2"] + params["dec_b2"], params["dec_bn2"]))
  recon = hd @ params["out_w"] + params["out_b"]
  return recon, logits, mu, logvar


def _check(got, ref, atol, rtol):
  for g, r in zip(got, ref):
    assert jnp.allclose(g, r, atol=atol, rtol=rtol), (
        f"max abs err {jnp.max(jnp.abs(g - r))}")


if __name__ == "__main__":
  B, INPUT_DIM, LATENT_DIM, NUM_CLASSES = 8, 32, 16, 8

  key = jax.random.PRNGKey(0)
  k_params, k_x, k_y, k_eps = jax.random.split(key, 4)

  params = init_params(k_params, INPUT_DIM, LATENT_DIM, NUM_CLASSES)
  x = jax.random.normal(k_x, (B, INPUT_DIM), jnp.float32)
  labels = jax.random.randint(k_y, (B,), 0, NUM_CLASSES)
  y_onehot = jax.nn.one_hot(labels, NUM_CLASSES, dtype=jnp.float32)
  eps = jax.random.normal(k_eps, (B, LATENT_DIM), jnp.float32)

  ref = cvae_ref(x, y_onehot, eps, params)

  # Exact f32 path (tight tolerance).
  out_f32 = jax.block_until_ready(
      cvae_forward(x, y_onehot, eps, params, use_bf16_matmul=False))
  _check(out_f32, ref, atol=1e-4, rtol=1e-4)

  # Default fast path: bf16 matmul operands, f32 accumulation (loose tolerance).
  out_bf16 = jax.block_until_ready(cvae_forward(x, y_onehot, eps, params))
  _check(out_bf16, ref, atol=5e-2, rtol=5e-2)

  # Multi-step grid + batch padding path (B not divisible by the tile).
  B2 = 40
  k2x, k2y, k2e = jax.random.split(jax.random.PRNGKey(1), 3)
  x2 = jax.random.normal(k2x, (B2, INPUT_DIM), jnp.float32)
  y2 = jax.nn.one_hot(jax.random.randint(k2y, (B2,), 0, NUM_CLASSES),
                      NUM_CLASSES, dtype=jnp.float32)
  e2 = jax.random.normal(k2e, (B2, LATENT_DIM), jnp.float32)
  out2 = jax.block_until_ready(
      cvae_forward(x2, y2, e2, params, block_batch=16, use_bf16_matmul=False))
  _check(out2, cvae_ref(x2, y2, e2, params), atol=1e-4, rtol=1e-4)

  print("KERNEL_OK")
</pallas_src>

<mosaic_0001>
module attributes {stable_mosaic.version = 11 : i64} {
  func.func @cvae_kernel(%arg0: i32, %arg1: memref<8x128xf32, #tpu.memory_space<vmem>>, %arg2: memref<32x256xf32, #tpu.memory_space<vmem>>, %arg3: memref<256x128xf32, #tpu.memory_space<vmem>>, %arg4: memref<128x32xf32, #tpu.memory_space<vmem>>, %arg5: memref<24x136xf32, #tpu.memory_space<vmem>>, %arg6: memref<128x256xf32, #tpu.memory_space<vmem>>, %arg7: memref<256x32xf32, #tpu.memory_space<vmem>>, %arg8: memref<4x512xf32, #tpu.memory_space<vmem>>, %arg9: memref<8x128xf32, #tpu.memory_space<vmem>>) attributes {dimension_semantics = [#tpu.dimension_semantics<parallel>], iteration_bounds = array<i64: 1>, scalar_prefetch = 0 : i64, scratch_operands = 0 : i64, tpu.core_type = #tpu.core_type<tc>, window_params = [{transform_indices = @transform_0, window_bounds = array<i64: 8, 128>}, {pipeline_mode = #tpu.pipeline_mode<synchronous>, transform_indices = @transform_1, window_bounds = array<i64: 32, 256>}, {pipeline_mode = #tpu.pipeline_mode<synchronous>, transform_indices = @transform_2, window_bounds = array<i64: 256, 128>}, {pipeline_mode = #tpu.pipeline_mode<synchronous>, transform_indices = @transform_3, window_bounds = array<i64: 128, 32>}, {pipeline_mode = #tpu.pipeline_mode<synchronous>, transform_indices = @transform_4, window_bounds = array<i64: 24, 136>}, {pipeline_mode = #tpu.pipeline_mode<synchronous>, transform_indices = @transform_5, window_bounds = array<i64: 128, 256>}, {pipeline_mode = #tpu.pipeline_mode<synchronous>, transform_indices = @transform_6, window_bounds = array<i64: 256, 32>}, {pipeline_mode = #tpu.pipeline_mode<synchronous>, transform_indices = @transform_7, window_bounds = array<i64: 4, 512>}, {transform_indices = @transform_8, window_bounds = array<i64: 8, 128>}]} {
    %c0 = arith.constant 0 : index
    %c0_0 = arith.constant 0 : index
    %0 = vector.load %arg1[%c0, %c0_0] : memref<8x128xf32, #tpu.memory_space<vmem>>, vector<8x128xf32>
    %1 = vector.extract_strided_slice %0 {offsets = [0, 0], sizes = [8, 32], strides = [1, 1]} : vector<8x128xf32> to vector<8x32xf32>
    %2 = vector.extract_strided_slice %0 {offsets = [0, 32], sizes = [8, 8], strides = [1, 1]} : vector<8x128xf32> to vector<8x8xf32>
    %3 = vector.extract_strided_slice %0 {offsets = [0, 40], sizes = [8, 16], strides = [1, 1]} : vector<8x128xf32> to vector<8x16xf32>
    %c0_1 = arith.constant 0 : index
    %c0_2 = arith.constant 0 : index
    %4 = vector.load %arg8[%c0_1, %c0_2] : memref<4x512xf32, #tpu.memory_space<vmem>>, vector<1x256xf32>
    %c1 = arith.constant 1 : index
    %c0_3 = arith.constant 0 : index
    %5 = vector.load %arg8[%c1, %c0_3] : memref<4x512xf32, #tpu.memory_space<vmem>>, vector<1x256xf32>
    %c2 = arith.constant 2 : index
    %c0_4 = arith.constant 0 : index
    %6 = vector.load %arg8[%c2, %c0_4] : memref<4x512xf32, #tpu.memory_space<vmem>>, vector<1x256xf32>
    %c3 = arith.constant 3 : index
    %c0_5 = arith.constant 0 : index
    %7 = vector.load %arg8[%c3, %c0_5] : memref<4x512xf32, #tpu.memory_space<vmem>>, vector<1x256xf32>
    %c0_6 = arith.constant 0 : index
    %c256 = arith.constant 256 : index
    %8 = vector.load %arg8[%c0_6, %c256] : memref<4x512xf32, #tpu.memory_space<vmem>>, vector<1x128xf32>
    %c1_7 = arith.constant 1 : index
    %c256_8 = arith.constant 256 : index
    %9 = vector.load %arg8[%c1_7, %c256_8] : memref<4x512xf32, #tpu.memory_space<vmem>>, vector<1x128xf32>
    %c2_9 = arith.constant 2 : index
    %c256_10 = arith.constant 256 : index
    %10 = vector.load %arg8[%c2_9, %c256_10] : memref<4x512xf32, #tpu.memory_space<vmem>>, vector<1x128xf32>
    %c3_11 = arith.constant 3 : index
    %c256_12 = arith.constant 256 : index
    %11 = vector.load %arg8[%c3_11, %c256_12] : memref<4x512xf32, #tpu.memory_space<vmem>>, vector<1x128xf32>
    %c0_13 = arith.constant 0 : index
    %c384 = arith.constant 384 : index
    %12 = vector.load %arg8[%c0_13, %c384] : memref<4x512xf32, #tpu.memory_space<vmem>>, vector<1x32xf32>
    %c1_14 = arith.constant 1 : index
    %c384_15 = arith.constant 384 : index
    %13 = vector.load %arg8[%c1_14, %c384_15] : memref<4x512xf32, #tpu.memory_space<vmem>>, vector<1x8xf32>
    %c2_16 = arith.constant 2 : index
    %c384_17 = arith.constant 384 : index
    %14 = vector.load %arg8[%c2_16, %c384_17] : memref<4x512xf32, #tpu.memory_space<vmem>>, vector<1x32xf32>
    %c0_18 = arith.constant 0 : index
    %c0_19 = arith.constant 0 : index
    %15 = vector.load %arg2[%c0_18, %c0_19] : memref<32x256xf32, #tpu.memory_space<vmem>>, vector<32x256xf32>
    %cst = arith.constant dense<0.000000e+00> : vector<8x256xf32>
    %16 = tpu.matmul %1, %15, %cst {dimension_numbers = #tpu.dot_dimension_numbers<[1], [0], [0], [1], [0, 0, 1, 1], [], []>} : vector<8x32xf32>, vector<32x256xf32>, vector<8x256xf32> -> vector<8x256xf32>
    %17 = vector.broadcast %4 : vector<1x256xf32> to vector<8x256xf32>
    %18 = arith.mulf %16, %17 : vector<8x256xf32>
    %19 = vector.broadcast %5 : vector<1x256xf32> to vector<8x256xf32>
    %20 = arith.addf %18, %19 : vector<8x256xf32>
    %cst_20 = arith.constant 0.000000e+00 : f32
    %21 = vector.broadcast %cst_20 : f32 to vector<8x256xf32>
    %22 = arith.maximumf %20, %21 : vector<8x256xf32>
    %c0_21 = arith.constant 0 : index
    %c0_22 = arith.constant 0 : index
    %23 = vector.load %arg3[%c0_21, %c0_22] : memref<256x128xf32, #tpu.memory_space<vmem>>, vector<256x128xf32>
    %cst_23 = arith.constant dense<0.000000e+00> : vector<8x128xf32>
    %24 = tpu.matmul %22, %23, %cst_23 {dimension_numbers = #tpu.dot_dimension_numbers<[1], [0], [0], [1], [0, 0, 1, 1], [], []>} : vector<8x256xf32>, vector<256x128xf32>, vector<8x128xf32> -> vector<8x128xf32>
    %25 = vector.broadcast %8 : vector<1x128xf32> to vector<8x128xf32>
    %26 = arith.mulf %24, %25 : vector<8x128xf32>
    %27 = vector.broadcast %9 : vector<1x128xf32> to vector<8x128xf32>
    %28 = arith.addf %26, %27 : vector<8x128xf32>
    %cst_24 = arith.constant 0.000000e+00 : f32
    %29 = vector.broadcast %cst_24 : f32 to vector<8x128xf32>
    %30 = arith.maximumf %28, %29 : vector<8x128xf32>
    %c0_25 = arith.constant 0 : index
    %c0_26 = arith.constant 0 : index
    %31 = vector.load %arg4[%c0_25, %c0_26] : memref<128x32xf32, #tpu.memory_space<vmem>>, vector<128x32xf32>
    %cst_27 = arith.constant dense<0.000000e+00> : vector<8x32xf32>
    %32 = tpu.matmul %30, %31, %cst_27 {dimension_numbers = #tpu.dot_dimension_numbers<[1], [0], [0], [1], [0, 0, 1, 1], [], []>} : vector<8x128xf32>, vector<128x32xf32>, vector<8x32xf32> -> vector<8x32xf32>
    %33 = vector.broadcast %12 : vector<1x32xf32> to vector<8x32xf32>
    %34 = arith.addf %32, %33 : vector<8x32xf32>
    %35 = vector.extract_strided_slice %34 {offsets = [0, 0], sizes = [8, 16], strides = [1, 1]} : vector<8x32xf32> to vector<8x16xf32>
    %36 = vector.extract_strided_slice %34 {offsets = [0, 16], sizes = [8, 16], strides = [1, 1]} : vector<8x32xf32> to vector<8x16xf32>
    %cst_28 = arith.constant 5.000000e-01 : f32
    %37 = vector.broadcast %cst_28 : f32 to vector<8x16xf32>
    %38 = arith.mulf %37, %36 : vector<8x16xf32>
    %39 = math.exp %38 : vector<8x16xf32>
    %40 = arith.mulf %3, %39 : vector<8x16xf32>
    %41 = arith.addf %35, %40 : vector<8x16xf32>
    %42 = tpu.concatenate %41, %2 in 1 : vector<8x16xf32>, vector<8x8xf32> -> vector<8x24xf32>
    %c0_29 = arith.constant 0 : index
    %c0_30 = arith.constant 0 : index
    %43 = vector.load %arg5[%c0_29, %c0_30] : memref<24x136xf32, #tpu.memory_space<vmem>>, vector<24x136xf32>
    %cst_31 = arith.constant dense<0.000000e+00> : vector<8x136xf32>
    %44 = tpu.matmul %42, %43, %cst_31 {dimension_numbers = #tpu.dot_dimension_numbers<[1], [0], [0], [1], [0, 0, 1, 1], [], []>} : vector<8x24xf32>, vector<24x136xf32>, vector<8x136xf32> -> vector<8x136xf32>
    %45 = vector.extract_strided_slice %44 {offsets = [0, 128], sizes = [8, 8], strides = [1, 1]} : vector<8x136xf32> to vector<8x8xf32>
    %46 = vector.broadcast %13 : vector<1x8xf32> to vector<8x8xf32>
    %47 = arith.addf %45, %46 : vector<8x8xf32>
    %48 = vector.extract_strided_slice %44 {offsets = [0, 0], sizes = [8, 128], strides = [1, 1]} : vector<8x136xf32> to vector<8x128xf32>
    %49 = vector.broadcast %10 : vector<1x128xf32> to vector<8x128xf32>
    %50 = arith.mulf %48, %49 : vector<8x128xf32>
    %51 = vector.broadcast %11 : vector<1x128xf32> to vector<8x128xf32>
    %52 = arith.addf %50, %51 : vector<8x128xf32>
    %cst_32 = arith.constant 0.000000e+00 : f32
    %53 = vector.broadcast %cst_32 : f32 to vector<8x128xf32>
    %54 = arith.maximumf %52, %53 : vector<8x128xf32>
    %c0_33 = arith.constant 0 : index
    %c0_34 = arith.constant 0 : index
    %55 = vector.load %arg6[%c0_33, %c0_34] : memref<128x256xf32, #tpu.memory_space<vmem>>, vector<128x256xf32>
    %cst_35 = arith.constant dense<0.000000e+00> : vector<8x256xf32>
    %56 = tpu.matmul %54, %55, %cst_35 {dimension_numbers = #tpu.dot_dimension_numbers<[1], [0], [0], [1], [0, 0, 1, 1], [], []>} : vector<8x128xf32>, vector<128x256xf32>, vector<8x256xf32> -> vector<8x256xf32>
    %57 = vector.broadcast %6 : vector<1x256xf32> to vector<8x256xf32>
    %58 = arith.mulf %56, %57 : vector<8x256xf32>
    %59 = vector.broadcast %7 : vector<1x256xf32> to vector<8x256xf32>
    %60 = arith.addf %58, %59 : vector<8x256xf32>
    %cst_36 = arith.constant 0.000000e+00 : f32
    %61 = vector.broadcast %cst_36 : f32 to vector<8x256xf32>
    %62 = arith.maximumf %60, %61 : vector<8x256xf32>
    %c0_37 = arith.constant 0 : index
    %c0_38 = arith.constant 0 : index
    %63 = vector.load %arg7[%c0_37, %c0_38] : memref<256x32xf32, #tpu.memory_space<vmem>>, vector<256x32xf32>
    %cst_39 = arith.constant dense<0.000000e+00> : vector<8x32xf32>
    %64 = tpu.matmul %62, %63, %cst_39 {dimension_numbers = #tpu.dot_dimension_numbers<[1], [0], [0], [1], [0, 0, 1, 1], [], []>} : vector<8x256xf32>, vector<256x32xf32>, vector<8x32xf32> -> vector<8x32xf32>
    %65 = vector.broadcast %14 : vector<1x32xf32> to vector<8x32xf32>
    %66 = arith.addf %64, %65 : vector<8x32xf32>
    %cst_40 = arith.constant 0.000000e+00 : f32
    %67 = vector.broadcast %cst_40 : f32 to vector<8x56xf32>
    %68 = tpu.concatenate %66, %47, %35, %36, %67 in 1 : vector<8x32xf32>, vector<8x8xf32>, vector<8x16xf32>, vector<8x16xf32>, vector<8x56xf32> -> vector<8x128xf32>
    %c0_41 = arith.constant 0 : index
    %c0_42 = arith.constant 0 : index
    %69 = vector.load %arg9[%c0_41, %c0_42] : memref<8x128xf32, #tpu.memory_space<vmem>>, vector<8x128xf32>
    tpu.vector_store %arg9[%c0_41, %c0_42], %68 {strides = array<i32>} : memref<8x128xf32, #tpu.memory_space<vmem>>, vector<8x128xf32>,
    return
  }
  func.func @transform_0(%arg0: i32) -> (i32, i32) {
    %c0_i32 = arith.constant 0 : i32
    %c0_i32_0 = arith.constant 0 : i32
    return %arg0, %c0_i32 : i32, i32
  }
  func.func @transform_1(%arg0: i32) -> (i32, i32) {
    %c0_i32 = arith.constant 0 : i32
    %c0_i32_0 = arith.constant 0 : i32
    %c0_i32_1 = arith.constant 0 : i32
    return %c0_i32, %c0_i32_0 : i32, i32
  }
  func.func @transform_2(%arg0: i32) -> (i32, i32) {
    %c0_i32 = arith.constant 0 : i32
    %c0_i32_0 = arith.constant 0 : i32
    %c0_i32_1 = arith.constant 0 : i32
    return %c0_i32, %c0_i32_0 : i32, i32
  }
  func.func @transform_3(%arg0: i32) -> (i32, i32) {
    %c0_i32 = arith.constant 0 : i32
    %c0_i32_0 = arith.constant 0 : i32
    %c0_i32_1 = arith.constant 0 : i32
    return %c0_i32, %c0_i32_0 : i32, i32
  }
  func.func @transform_4(%arg0: i32) -> (i32, i32) {
    %c0_i32 = arith.constant 0 : i32
    %c0_i32_0 = arith.constant 0 : i32
    %c0_i32_1 = arith.constant 0 : i32
    return %c0_i32, %c0_i32_0 : i32, i32
  }
  func.func @transform_5(%arg0: i32) -> (i32, i32) {
    %c0_i32 = arith.constant 0 : i32
    %c0_i32_0 = arith.constant 0 : i32
    %c0_i32_1 = arith.constant 0 : i32
    return %c0_i32, %c0_i32_0 : i32, i32
  }
  func.func @transform_6(%arg0: i32) -> (i32, i32) {
    %c0_i32 = arith.constant 0 : i32
    %c0_i32_0 = arith.constant 0 : i32
    %c0_i32_1 = arith.constant 0 : i32
    return %c0_i32, %c0_i32_0 : i32, i32
  }
  func.func @transform_7(%arg0: i32) -> (i32, i32) {
    %c0_i32 = arith.constant 0 : i32
    %c0_i32_0 = arith.constant 0 : i32
    %c0_i32_1 = arith.constant 0 : i32
    return %c0_i32, %c0_i32_0 : i32, i32
  }
  func.func @transform_8(%arg0: i32) -> (i32, i32) {
    %c0_i32 = arith.constant 0 : i32
    %c0_i32_0 = arith.constant 0 : i32
    return %arg0, %c0_i32 : i32, i32
  }
}

</mosaic_0001>

<bundles_post_ra>
// kernel: cvae_forward.1
= control target key start
LH: loop header
LB: loop body
LE: loop exit
PB: predicated region body
PF: predicated region fallthrough
CT: control target
= control target key end

     0   :  { %v1006_v3 = vmov 0.0   ;;  %vm52_vm0 = vcmask 261120   ;;  %v1007_v62 = vmov 0.0|0.0   ;;  %vm1008_vm1 = vmmov 0   ;;  %s1009_s29 = smov 112   ;;  %s1010_s16 = smov 24   ;;  %s1499_s1 = inlined_call_operand.vmem [shape: f32[32,256], index: 1, kind: input, shape index: {}]   ;;  %s1500_s2 = inlined_call_operand.vmem [shape: f32[256,128], index: 2, kind: input, shape index: {}]   ;;  %s1501_s0 = inlined_call_operand.vmem [shape: f32[8,128], index: 0, kind: input, shape index: {}]   ;;  %s1502_s3 = inlined_call_operand.vmem [shape: f32[128,32], index: 3, kind: input, shape index: {}]   ;;  %s1503_s7 = inlined_call_operand.vmem [shape: f32[4,512], index: 7, kind: input, shape index: {}]   ;;  %s1504_s4 = inlined_call_operand.vmem [shape: f32[24,136], index: 4, kind: input, shape index: {}]   ;;  %s1505_s5 = inlined_call_operand.vmem [shape: f32[128,256], index: 5, kind: input, shape index: {}]   ;;  %s1506_s6 = inlined_call_operand.vmem [shape: f32[256,32], index: 6, kind: input, shape index: {}]   ;;  %s1507_s8 = inlined_call_operand.vmem [shape: f32[8,128], index: 8, kind: output, shape index: {}]  }
   0x1   :  { %v45_v0 = vld [vmem:[%s1499_s1 + $0x8] sm:$0xff]  ;;  %v47_v1 = vld [vmem:[%s1499_s1 + $0x18] sm:$0xff]  ;;  %v44_v2 = vld [vmem:[%s1499_s1] sm:$0xff]  ;;  %120 = vmatprep.mubr.f32.mxu0 %v1006_v3  ;;  %s1011_s24 = smov 88   ;;  %s1012_s25 = smov 40   ;;  %vm374_vm2 = vcmask 130048  }
   0x2   :  { %v864_v4 = vpack.c.bf16 %v47_v1, %v45_v0  ;;  %v46_v5 = vld [vmem:[%s1499_s1 + $0x10] sm:$0xff]  ;;  %v49_v6 = vld [vmem:[%s1499_s1 + $0x28] sm:$0xff]  ;;  %v51_v7 = vld [vmem:[%s1499_s1 + $0x38] sm:$0xff]  ;;  %vm382_vm3 = vcmask 195584   ;;  %s1013_s19 = smov 32   ;;  %vm719_vm4 = vcmask 326656  }
   0x3   :  { %v866_v8 = vpack.c.bf16 %v46_v5, %v44_v2  ;;  %v868_v9 = vpack.c.bf16 %v51_v7, %v49_v6  ;;  %v48_v10 = vld [vmem:[%s1499_s1 + $0x20] sm:$0xff]  ;;  %v50_v11 = vld [vmem:[%s1499_s1 + $0x30] sm:$0xff]  ;;  %v172_v13 = vld [vmem:[%s1500_s2 + $0x88] sm:$0xff]  ;;  %vm721_vm5 = vcmask 457728   ;;  %vm723_vm6 = vcmask 588800  }
   0x4   :  { %865 = vmatprep.subr.bf16.mxu0 %v864_v4  ;;  %v171_v12 = vld [vmem:[%s1500_s2 + $0x80] sm:$0xff]  ;;  %v870_v15 = vpack.c.bf16 %v50_v11, %v48_v10  ;;  %v156_v17 = vld [vmem:[%s1500_s2 + $0x8] sm:$0xff]  ;;  %v173_v18 = vld [vmem:[%s1500_s2 + $0x90] sm:$0xff] }
   0x5   :  { %v155_v14 = vld [vmem:[%s1500_s2] sm:$0xff]  ;;  %867 = vmatpush1.bf16.msra.mxu0 %v866_v8  ;;  %v872_v16 = vpack.c.bf16 %v172_v13, %v171_v12  ;;  %v174_v19 = vld [vmem:[%s1500_s2 + $0x98] sm:$0xff]  ;;  %v157_v22 = vld [vmem:[%s1500_s2 + $0x10] sm:$0xff] }
   0x6   :  { %869 = vmatprep.subr.bf16.mxu0 %v868_v9  ;;  %v874_v20 = vpack.c.bf16 %v156_v17, %v155_v14  ;;  %v876_v21 = vpack.c.bf16 %v174_v19, %v173_v18  ;;  %v158_v23 = vld [vmem:[%s1500_s2 + $0x18] sm:$0xff]  ;;  %v175_v24 = vld [vmem:[%s1500_s2 + $0xa0] sm:$0xff]  ;;  %v176_v25 = vld [vmem:[%s1500_s2 + $0xa8] sm:$0xff]  ;;  %v128_v18 = vlaneseq }
   0x7   :  { %873 = vmatprep.subr.bf16.mxu1 %v872_v16  ;;  %v878_v26 = vpack.c.bf16 %v158_v23, %v157_v22  ;;  %v1117_v27 = vld [vmem:[%s1501_s0] sm:$0xff]  ;;  %v880_v28 = vpack.c.bf16 %v176_v25, %v175_v24  ;;  %v160_v30 = vld [vmem:[%s1500_s2 + $0x28] sm:$0xff]  ;;  %v177_v31 = vld [vmem:[%s1500_s2 + $0xb0] sm:$0xff] }
   0x8   :  { %875 = vmatpush3.bf16.msra.mxu1 %v874_v20  ;;  %v159_v29 = vld [vmem:[%s1500_s2 + $0x20] sm:$0xff]  ;;  %v178_v32 = vld [vmem:[%s1500_s2 + $0xb8] sm:$0xff]  ;;  %v161_v35 = vld [vmem:[%s1500_s2 + $0x30] sm:$0xff]  ;;  %v129_v19 = vshrl.u32 %v128_v18, 7  ;;  %371 = vrot.lane.b32.xlu1 %v1117_v27, %s1009_s29 }
   0x9   :  { %871 = vmatpush1.bf16.msra.mxu0 %v870_v15  ;;  %877 = vmatprep.subr.bf16.mxu1 %v876_v21  ;;  %v882_v33 = vpack.c.bf16 %v160_v30, %v159_v29  ;;  %v884_v34 = vpack.c.bf16 %v178_v32, %v177_v31  ;;  %v162_v36 = vld [vmem:[%s1500_s2 + $0x38] sm:$0xff]  ;;  %v179_v37 = vld [vmem:[%s1500_s2 + $0xc0] sm:$0xff]  ;;  %v180_v38 = vld [vmem:[%s1500_s2 + $0xc8] sm:$0xff] }
   0xa   :  { %v886_v39 = vpack.c.bf16 %v162_v36, %v161_v35  ;;  %v888_v40 = vpack.c.bf16 %v180_v38, %v179_v37  ;;  %v163_v41 = vld [vmem:[%s1500_s2 + $0x40] sm:$0xff]  ;;  %v164_v42 = vld [vmem:[%s1500_s2 + $0x48] sm:$0xff]  ;;  %v181_v43 = vld [vmem:[%s1500_s2 + $0xd0] sm:$0xff]  ;;  %904 = vmatprep.subr.bf16.mxu0 %v1007_v62  ;;  %v1223_v20 = vsub.s32 0, %v129_v19  ;;  %v1228_v22 = vsub.s32 1, %v129_v19 }
   0xb   :  { %v182_v44 = vld [vmem:[%s1500_s2 + $0xd8] sm:$0xff]  ;;  %v890_v45 = vpack.c.bf16 %v164_v42, %v163_v41  ;;  %v165_v47 = vld [vmem:[%s1500_s2 + $0x50] sm:$0xff]  ;;  %v183_v50 = vld [vmem:[%s1500_s2 + $0xe0] sm:$0xff] }
   0xc   :  { %733 = vmatmul.mubr.msk.f32.vlgmr.msra.gmra.mrb[0].mxu0 %vm52_vm0, %v1117_v27  ;;  %879 = vmatpush3.bf16.msra.mxu1 %v878_v26  ;;  %v892_v46 = vpack.c.bf16 %v182_v44, %v181_v43  ;;  %v166_v48 = vld [vmem:[%s1500_s2 + $0x58] sm:$0xff]  ;;  %v184_v51 = vld [vmem:[%s1500_s2 + $0xe8] sm:$0xff]  ;;  %v167_v53 = vld [vmem:[%s1500_s2 + $0x60] sm:$0xff] }
   0xd   :  { %881 = vmatprep.subr.bf16.mxu1 %v880_v28  ;;  %v894_v49 = vpack.c.bf16 %v166_v48, %v165_v47  ;;  %v896_v52 = vpack.c.bf16 %v184_v51, %v183_v50  ;;  %v168_v54 = vld [vmem:[%s1500_s2 + $0x68] sm:$0xff]  ;;  %v185_v56 = vld [vmem:[%s1500_s2 + $0xf0] sm:$0xff]  ;;  %v186_v57 = vld [vmem:[%s1500_s2 + $0xf8] sm:$0xff]  ;;  %861 = vmatprep.mubr.msk.f32.mxu0 %vm1008_vm1, %v1006_v3 }
   0xe   :  { %v898_v55 = vpack.c.bf16 %v168_v54, %v167_v53  ;;  %v900_v58 = vpack.c.bf16 %v186_v57, %v185_v56  ;;  %v169_v59 = vld [vmem:[%s1500_s2 + $0x70] sm:$0xff]  ;;  %v170_v60 = vld [vmem:[%s1500_s2 + $0x78] sm:$0xff]  ;;  %v268_v63 = vld [vmem:[%s1502_s3] sm:$0xff] }
   0xf   :  { %v902_v61 = vpack.c.bf16 %v170_v60, %v169_v59  ;;  %v269_v0 = vld [vmem:[%s1502_s3 + $0x8] sm:$0xff]  ;;  %v270_v1 = vld [vmem:[%s1502_s3 + $0x10] sm:$0xff]  ;;  %v271_v4 = vld [vmem:[%s1502_s3 + $0x18] sm:$0xff] }
  0x10   :  { %883 = vmatpush3.bf16.msra.mxu1 %v882_v33  ;;  %v905_v2 = vpack.c.bf16 %v269_v0, %v268_v63  ;;  %v908_v5 = vpack.c.bf16 %v271_v4, %v270_v1  ;;  %v272_v6 = vld [vmem:[%s1502_s3 + $0x20] sm:$0xff]  ;;  %v273_v7 = vld [vmem:[%s1502_s3 + $0x28] sm:$0xff]  ;;  %v274_v9 = vld [vmem:[%s1502_s3 + $0x30] sm:$0xff] }
  0x11   :  { %885 = vmatprep.subr.bf16.mxu1 %v884_v34  ;;  %v911_v8 = vpack.c.bf16 %v273_v7, %v272_v6  ;;  %v275_v10 = vld [vmem:[%s1502_s3 + $0x38] sm:$0xff]  ;;  %v276_v12 = vld [vmem:[%s1502_s3 + $0x40] sm:$0xff]  ;;  %v277_v13 = vld [vmem:[%s1502_s3 + $0x48] sm:$0xff] }
  0x12   :  { %906 = vmatpush3.bf16.msra.mxu0 %v905_v2  ;;  %v914_v11 = vpack.c.bf16 %v275_v10, %v274_v9  ;;  %v917_v14 = vpack.c.bf16 %v277_v13, %v276_v12  ;;  %v278_v15 = vld [vmem:[%s1502_s3 + $0x50] sm:$0xff]  ;;  %v279_v16 = vld [vmem:[%s1502_s3 + $0x58] sm:$0xff]  ;;  %v30_v21 = vld [vmem:[%s1503_s7] ss:$4 sm:$0x3] }
  0x13   :  { %907 = vmatprep.subr.bf16.mxu0 %v1007_v62  ;;  %v920_v17 = vpack.c.bf16 %v279_v16, %v278_v15  ;;  %v730_v23 = vld [vmem:[%s1503_s7 + $0x1] ss:$4 sm:$0x3]  ;;  %v131_v24 = vrot.slane %v30_v21, %v1223_v20  ;;  %v135_v25 = vrot.slane %v30_v21, %v1228_v22  ;;  %v281_v38 = vld [vmem:[%s1502_s3 + $0x68] sm:$0xff]  ;;  %v283_v41 = vld [vmem:[%s1502_s3 + $0x78] sm:$0xff] }
  0x14   :  { %887 = vmatpush3.bf16.msra.mxu1 %v886_v39  ;;  %v144_v26 = vrot.slane %v730_v23, %v1223_v20  ;;  %v148_v29 = vrot.slane %v730_v23, %v1228_v22  ;;  %v280_v37 = vld [vmem:[%s1502_s3 + $0x60] sm:$0xff]  ;;  %v734_v44 = vld [vmem:[%s1503_s7 + $0x8] ss:$0 sm:$0xff]  ;;  %v735_v47 = vld [vmem:[%s1503_s7 + $0x9] ss:$0 sm:$0xff] }
  0x15   :  { %889 = vmatprep.subr.bf16.mxu1 %v888_v40  ;;  %v923_v39 = vpack.c.bf16 %v281_v38, %v280_v37  ;;  %v282_v40 = vld [vmem:[%s1502_s3 + $0x70] sm:$0xff]  ;;  %v736_v51 = vld [vmem:[%s1503_s7 + $0xc] ss:$0 sm:$0xff]  ;;  %v376_v59 = vld [vmem:[%s1504_s4] sm:$0xff] }
  0x16   :  { %909 = vmatpush3.bf16.msra.mxu0 %v908_v5  ;;  %v926_v42 = vpack.c.bf16 %v283_v41, %v282_v40  ;;  %v377_v57 = vld [vmem:[%s1504_s4 + $0x8] sm:$0xff]  ;;  %v380_v1 = vld [vmem:[%s1504_s4 + $0x20] sm:$0xff]  ;;  %v476_v4 = vld [vmem:[%s1505_s5 + $0x18] sm:$0xff] }
  0x17   :  { %910 = vmatprep.subr.bf16.mxu0 %v1007_v62  ;;  %v381_v0 = vld [vmem:[%s1504_s4 + $0x28] sm:$0xff]  ;;  %v475_v9 = vld [vmem:[%s1505_s5 + $0x10] sm:$0xff]  ;;  %v477_v16 = vld [vmem:[%s1505_s5 + $0x20] sm:$0xff] }
  0x18   :  { %891 = vmatpush3.bf16.msra.mxu1 %v890_v45  ;;  %v474_v2 = vld [vmem:[%s1505_s5 + $0x8] sm:$0xff]  ;;  %v484_v21 = vld [vmem:[%s1505_s5 + $0x58] sm:$0xff]  ;;  %v489_v37 = vld [vmem:[%s1505_s5 + $0x80] sm:$0xff] }
  0x19   :  { %893 = vmatprep.subr.bf16.mxu1 %v892_v46  ;;  %v932_v5 = vpack.c.bf16 %v476_v4, %v474_v2  ;;  %v478_v10 = vld [vmem:[%s1505_s5 + $0x28] sm:$0xff]  ;;  %v491_v38 = vld [vmem:[%s1505_s5 + $0x90] sm:$0xff]  ;;  %v496_v40 = vld [vmem:[%s1505_s5 + $0xb8] sm:$0xff] }
  0x1a   :  { %912 = vmatpush3.bf16.msra.mxu0 %v911_v8  ;;  %v473_v8 = vld [vmem:[%s1505_s5] sm:$0xff]  ;;  %v482_v19 = vld [vmem:[%s1505_s5 + $0x48] sm:$0xff]  ;;  %v950_v41 = vpack.c.bf16 %v491_v38, %v489_v37  ;;  %v606_v4 = vld [vmem:[%s1506_s6 + $0x10] sm:$0xff] }
  0x1b   :  { %913 = vmatprep.subr.bf16.mxu0 %v1007_v62  ;;  %v614_v38 = vld [vmem:[%s1506_s6 + $0x50] sm:$0xff] }
  0x1c   :  { %895 = vmatpush3.bf16.msra.mxu1 %v894_v49 }
  0x1d   :  { %897 = vmatprep.subr.bf16.mxu1 %v896_v52 }
  0x1e   :  { %915 = vmatpush3.bf16.msra.mxu0 %v914_v11 }
  0x1f   :  { %916 = vmatprep.subr.bf16.mxu0 %v1007_v62 }
  0x20   :  { %899 = vmatpush3.bf16.msra.mxu1 %v898_v55 }
  0x21   :  { %901 = vmatprep.subr.bf16.mxu1 %v900_v58  ;;  %v379_v58 = vld [vmem:[%s1504_s4 + $0x18] sm:$0xff] }
  0x22   :  { %918 = vmatpush3.bf16.msra.mxu0 %v917_v14  ;;  %v928_v60 = vpack.c.bf16 %v379_v58, %v377_v57  ;;  %v934_v14 = vpack.c.bf16 %v475_v9, %v473_v8  ;;  %v620_v58 = vld [vmem:[%s1506_s6 + $0x80] sm:$0xff] }
  0x23   :  { %919 = vmatprep.subr.bf16.mxu0 %v1007_v62 }
  0x24   :  { %903 = vmatpush3.bf16.msra.mxu1 %v902_v61  ;;  %v378_v61 = vld [vmem:[%s1504_s4 + $0x10] sm:$0xff] }
  0x25   :  { %929 = vmatprep.subr.bf16.mxu1 %v928_v60  ;;  %v604_v60 = vld [vmem:[%s1506_s6] sm:$0xff] }
  0x26   :  { %921 = vmatpush3.bf16.msra.mxu0 %v920_v17  ;;  %v479_v17 = vld [vmem:[%s1505_s5 + $0x30] sm:$0xff] }
  0x27   :  { %922 = vmatprep.subr.bf16.mxu0 %v1007_v62  ;;  %v938_v23 = vpack.c.bf16 %v479_v17, %v477_v16  ;;  %v740_v16 = vld [vmem:[%s1503_s7 + $0xb] ss:$0 sm:$0xff] }
  0x2a   :  { %924 = vmatpush3.bf16.msra.mxu0 %v923_v39  ;;  %v494_v39 = vld [vmem:[%s1505_s5 + $0xa8] sm:$0xff] }
  0x2b   :  { %925 = vmatprep.subr.bf16.mxu0 %v1007_v62  ;;  %v930_v62 = vpack.c.bf16 %v378_v61, %v376_v59  ;;  %v621_v59 = vld [vmem:[%s1506_s6 + $0x88] sm:$0xff] }
  0x2c   :  { %v964_v61 = vpack.c.bf16 %v621_v59, %v620_v58 }
  0x2e   :  { %927 = vmatpush3.bf16.msra.mxu0 %v926_v42  ;;  %v952_v42 = vpack.c.bf16 %v496_v40, %v494_v39  ;;  %v615_v39 = vld [vmem:[%s1506_s6 + $0x58] sm:$0xff] }
  0x2f   :  { %965 = vmatprep.subr.bf16.mxu0 %v964_v61  ;;  %v986_v40 = vpack.c.bf16 %v615_v39, %v614_v38 }
  0x7a   :  { %v372_v12 = vpop.permute.xlu1 %371 }
  0xdf   :  { %v122_v28 = vpop.f32.mrb[0].mxu0 }
  0xe0   :  { %v138_v30 = vmul.f32 %v131_v24, %v122_v28  ;;  %v124_v31 = vpop.f32.mrb[1].mxu0  ;;  %v940_v24 = vpack.c.bf16 %v484_v21, %v482_v19  ;;  %v486_v28 = vld [vmem:[%s1505_s5 + $0x68] sm:$0xff]  ;;  %v610_v19 = vld [vmem:[%s1506_s6 + $0x30] sm:$0xff]  ;;  %v611_v21 = vld [vmem:[%s1506_s6 + $0x38] sm:$0xff] }
  0xe1   :  { %v139_v32 = vmul.f32 %v135_v25, %v124_v31  ;;  %v481_v25 = vld [vmem:[%s1505_s5 + $0x40] sm:$0xff] }
  0xe2   :  { %v151_v33 = vadd.f32 %v144_v26, %v138_v30  ;;  %v483_v26 = vld [vmem:[%s1505_s5 + $0x50] sm:$0xff]  ;;  %v485_v31 = vld [vmem:[%s1505_s5 + $0x60] sm:$0xff] }
  0xe3   :  { %v152_v34 = vadd.f32 %v148_v29, %v139_v32  ;;  %v488_v29 = vld [vmem:[%s1505_s5 + $0x78] sm:$0xff]  ;;  %v487_v32 = vld [vmem:[%s1505_s5 + $0x70] sm:$0xff] }
  0xe4   :  { %v153_v36 = vmax.f32 %v151_v33, 0.0  ;;  %v944_v30 = vpack.c.bf16 %v488_v29, %v486_v28  ;;  %v490_v33 = vld [vmem:[%s1505_s5 + $0x88] sm:$0xff] }
  0xe5   :  { %v154_v35 = vmax.f32 %v152_v34, 0.0  ;;  %v492_v34 = vld [vmem:[%s1505_s5 + $0x98] sm:$0xff] }
  0xe7   :  { %251 = vmatprep.mubr.f32.mxu1 %v154_v35  ;;  %v946_v35 = vpack.c.bf16 %v487_v32, %v485_v31  ;;  %v612_v31 = vld [vmem:[%s1506_s6 + $0x40] sm:$0xff]  ;;  %v613_v32 = vld [vmem:[%s1506_s6 + $0x48] sm:$0xff] }
  0xe8   :  { %252 = vmatmul.mubr.f32.vlgmr.msra.gmra.mrb[0].mxu1 %v153_v36  ;;  %v948_v36 = vpack.c.bf16 %v492_v34, %v490_v33  ;;  %v630_v34 = vld [vmem:[%s1506_s6 + $0xd0] sm:$0xff] }
  0xe9   :  { %450 = vmatprep.mubr.f32.mxu1 %v1006_v3  ;;  %931 = vmatpush1.bf16.msra.mxu1 %v930_v62  ;;  %v605_v62 = vld [vmem:[%s1506_s6 + $0x8] sm:$0xff] }
  0xea   :  { %390 = vmatprep.subr.mxu1 %v381_v0  ;;  %v623_v0 = vld [vmem:[%s1506_s6 + $0x98] sm:$0xff] }
  0xed   :  { %391 = vmatpush1.msra.mxu1 %v380_v1  ;;  %v966_v1 = vpack.c.bf16 %v605_v62, %v604_v60 }
  0xee   :  { %933 = vmatprep.subr.bf16.mxu1 %v932_v5  ;;  %v607_v5 = vld [vmem:[%s1506_s6 + $0x18] sm:$0xff] }
  0xef   :  { %v970_v8 = vpack.c.bf16 %v607_v5, %v606_v4  ;;  %v741_v5 = vld [vmem:[%s1503_s7 + $0xe] ss:$0 sm:$0xff] }
 0x1bb   :  { %v774_v43 = vpop.f32.mrb[0].mxu1 }
 0x1bc   :  { %v775_v45 = vpop.f32.mrb[1].mxu1 }
 0x1bd   :  { %v776_v46 = vadd.f32 %v775_v45, %v774_v43  ;;  %v493_v43 = vld [vmem:[%s1505_s5 + $0xa0] sm:$0xff]  ;;  %v498_v45 = vld [vmem:[%s1505_s5 + $0xc8] sm:$0xff] }
 0x1bf   :  { %v261_v48 = vmul.f32 %v776_v46, %v734_v44  ;;  %v495_v44 = vld [vmem:[%s1505_s5 + $0xb0] sm:$0xff]  ;;  %v500_v46 = vld [vmem:[%s1505_s5 + $0xd8] sm:$0xff] }
 0x1c1   :  { %v266_v49 = vadd.f32 %v735_v47, %v261_v48  ;;  %v954_v47 = vpack.c.bf16 %v495_v44, %v493_v43  ;;  %v956_v48 = vpack.c.bf16 %v500_v46, %v498_v45  ;;  %v616_v44 = vld [vmem:[%s1506_s6 + $0x60] sm:$0xff]  ;;  %v617_v45 = vld [vmem:[%s1506_s6 + $0x68] sm:$0xff] }
 0x1c2   :  { %v990_v46 = vpack.c.bf16 %v617_v45, %v616_v44 }
 0x1c3   :  { %v267_v50 = vmax.f32 %v266_v49, 0.0  ;;  %v497_v49 = vld [vmem:[%s1505_s5 + $0xc0] sm:$0xff] }
 0x1c5   :  { %862 = vmatmul.mubr.f32.vlgmr.msra.gmra.mrb[2].mxu0 %v267_v50  ;;  %v499_v50 = vld [vmem:[%s1505_s5 + $0xd0] sm:$0xff] }
 0x1c6   :  { %967 = vmatpush3.bf16.msra.mxu0 %v966_v1 }
 0x298   :  { %v354_v52 = vpop.f32.mrb[2].mxu0 }
 0x299   :  { %v355_v53 = vadd.f32 %v736_v51, %v354_v52  ;;  %v863_v54 = vpop.f32.mrb[3].mxu0  ;;  %v958_v51 = vpack.c.bf16 %v499_v50, %v497_v49  ;;  %v502_v52 = vld [vmem:[%s1505_s5 + $0xe8] sm:$0xff]  ;;  %v618_v50 = vld [vmem:[%s1506_s6 + $0x70] sm:$0xff] }
 0x29b   :  { %v358_v55 = vmul.f32 0.5, %v355_v53 }
 0x29d   :  { %v359_v56 = vmul.f32 1.442695, %v358_v55  ;;  %v501_v55 = vld [vmem:[%s1505_s5 + $0xe0] sm:$0xff] }
 0x29f   :  { %1004 = vpow2.f32 %v359_v56  ;;  %v503_v56 = vld [vmem:[%s1505_s5 + $0xf0] sm:$0xff] }
 0x2a0   :  { %v962_v57 = vpack.c.bf16 %v503_v56, %v501_v55 }
 0x2a9   :  { %v1005_v63 = vpop.eup %1004 }
 0x2aa   :  { %362 = vrot.lane.b32.xlu0 %v1005_v63, %s1010_s16  ;;  %v622_v63 = vld [vmem:[%s1506_s6 + $0x90] sm:$0xff] }
 0x2ab   :  { %v968_v2 = vpack.c.bf16 %v623_v0, %v622_v63 }
 0x2ad   :  { %969 = vmatprep.subr.bf16.mxu0 %v968_v2 }
 0x2ae   :  { %971 = vmatpush3.bf16.msra.mxu0 %v970_v8 }
 0x31c   :  { %v363_v6 = vpop.permute.xlu0 %362 }
 0x31d   :  { %v365_v7 = vmul.f32 %v363_v6, %v1117_v27  ;;  %v480_v27 = vld [vmem:[%s1505_s5 + $0x38] sm:$0xff]  ;;  %v624_v6 = vld [vmem:[%s1506_s6 + $0xa0] sm:$0xff] }
 0x31e   :  { %v936_v15 = vpack.c.bf16 %v480_v27, %v478_v10  ;;  %v608_v10 = vld [vmem:[%s1506_s6 + $0x20] sm:$0xff]  ;;  %v609_v27 = vld [vmem:[%s1506_s6 + $0x28] sm:$0xff] }
 0x31f   :  { %367 = vrot.lane.b32.xlu0 %v365_v7, %s1011_s24  ;;  %v625_v7 = vld [vmem:[%s1506_s6 + $0xa8] sm:$0xff] }
 0x320   :  { %v972_v9 = vpack.c.bf16 %v625_v7, %v624_v6 }
 0x322   :  { %973 = vmatprep.subr.bf16.mxu0 %v972_v9 }
 0x323   :  { %715 = vrot.lane.b32.xlu0 %v355_v53, %s1012_s25 }
 0x391   :  { %v368_v11 = vpop.permute.xlu0 %367 }
 0x392   :  { %v370_v13 = vadd.f32 %v368_v11, %v355_v53  ;;  %v504_v53 = vld [vmem:[%s1505_s5 + $0xf8] sm:$0xff]  ;;  %v626_v11 = vld [vmem:[%s1506_s6 + $0xb0] sm:$0xff] }
 0x393   :  { %v960_v54 = vpack.c.bf16 %v504_v53, %v502_v52  ;;  %v731_v53 = vld [vmem:[%s1503_s7 + $0x2] ss:$4 sm:$0x3] }
 0x394   :  { %v375_v18 = vsel %vm374_vm2, %v370_v13, %v372_v12  ;;  %v627_v12 = vld [vmem:[%s1506_s6 + $0xb8] sm:$0xff]  ;;  %v739_v13 = vld [vmem:[%s1503_s7 + $0xa] ss:$0 sm:$0xff]  ;;  %v580_v55 = vrot.slane %v731_v53, %v1223_v20  ;;  %v584_v56 = vrot.slane %v731_v53, %v1228_v22 }
 0x395   :  { %737 = vmatmul.mubr.msk.f32.vlgmr.msra.gmra.mrb[2].mxu1 %vm382_vm3, %v375_v18  ;;  %v976_v18 = vpack.c.bf16 %v627_v12, %v626_v11 }
 0x396   :  { %935 = vmatpush1.bf16.msra.mxu1 %v934_v14  ;;  %569 = vmatprep.mubr.f32.mxu1 %v1006_v3  ;;  %v942_v3 = vpack.c.bf16 %v483_v26, %v481_v25  ;;  %v738_v14 = vld [vmem:[%s1503_s7 + $0xd] ss:$0 sm:$0xff]  ;;  %v628_v25 = vld [vmem:[%s1506_s6 + $0xc0] sm:$0xff] }
 0x397   :  { %937 = vmatprep.subr.bf16.mxu1 %v936_v15  ;;  %v974_v15 = vpack.c.bf16 %v609_v27, %v608_v10  ;;  %v629_v26 = vld [vmem:[%s1506_s6 + $0xc8] sm:$0xff] }
 0x399   :  { %975 = vmatpush3.bf16.msra.mxu0 %v974_v15 }
 0x39a   :  { %939 = vmatpush1.bf16.msra.mxu1 %v938_v23  ;;  %977 = vmatprep.subr.bf16.mxu0 %v976_v18 }
 0x39b   :  { %941 = vmatprep.subr.bf16.mxu1 %v940_v24 }
 0x39e   :  { %943 = vmatpush1.bf16.msra.mxu1 %v942_v3  ;;  %v978_v3 = vpack.c.bf16 %v611_v21, %v610_v19 }
 0x39f   :  { %945 = vmatprep.subr.bf16.mxu1 %v944_v30  ;;  %v980_v30 = vpack.c.bf16 %v629_v26, %v628_v25 }
 0x3a0   :  { %979 = vmatpush3.bf16.msra.mxu0 %v978_v3 }
 0x3a1   :  { %981 = vmatprep.subr.bf16.mxu0 %v980_v30 }
 0x3a2   :  { %947 = vmatpush1.bf16.msra.mxu1 %v946_v35  ;;  %v631_v35 = vld [vmem:[%s1506_s6 + $0xd8] sm:$0xff] }
 0x3a3   :  { %949 = vmatprep.subr.bf16.mxu1 %v948_v36  ;;  %v982_v36 = vpack.c.bf16 %v613_v32, %v612_v31  ;;  %v984_v37 = vpack.c.bf16 %v631_v35, %v630_v34 }
 0x3a5   :  { %983 = vmatpush3.bf16.msra.mxu0 %v982_v36 }
 0x3a6   :  { %951 = vmatpush1.bf16.msra.mxu1 %v950_v41  ;;  %985 = vmatprep.subr.bf16.mxu0 %v984_v37  ;;  %v632_v41 = vld [vmem:[%s1506_s6 + $0xe0] sm:$0xff] }
 0x3a7   :  { %953 = vmatprep.subr.bf16.mxu1 %v952_v42  ;;  %v633_v42 = vld [vmem:[%s1506_s6 + $0xe8] sm:$0xff] }
 0x3a8   :  { %v988_v43 = vpack.c.bf16 %v633_v42, %v632_v41 }
 0x3a9   :  { %987 = vmatpush3.bf16.msra.mxu0 %v986_v40 }
 0x3aa   :  { %955 = vmatpush1.bf16.msra.mxu1 %v954_v47  ;;  %989 = vmatprep.subr.bf16.mxu0 %v988_v43  ;;  %v634_v47 = vld [vmem:[%s1506_s6 + $0xf0] sm:$0xff] }
 0x3ab   :  { %957 = vmatprep.subr.bf16.mxu1 %v956_v48  ;;  %v635_v48 = vld [vmem:[%s1506_s6 + $0xf8] sm:$0xff] }
 0x3ac   :  { %v992_v49 = vpack.c.bf16 %v635_v48, %v634_v47 }
 0x3ad   :  { %991 = vmatpush3.bf16.msra.mxu0 %v990_v46 }
 0x3ae   :  { %959 = vmatpush1.bf16.msra.mxu1 %v958_v51  ;;  %v619_v51 = vld [vmem:[%s1506_s6 + $0x78] sm:$0xff]  ;;  %993 = vmatprep.subr.bf16.mxu0 %v992_v49 }
 0x3af   :  { %961 = vmatprep.subr.bf16.mxu1 %v960_v54  ;;  %v994_v52 = vpack.c.bf16 %v619_v51, %v618_v50  ;;  %v732_v54 = vld [vmem:[%s1503_s7 + $0x3] ss:$4 sm:$0x3] }
 0x3b0   :  { %v597_v59 = vrot.slane %v732_v54, %v1228_v22  ;;  %v716_v22 = vpop.permute.xlu0 %715 }
 0x3b1   :  { %995 = vmatpush3.bf16.msra.mxu0 %v994_v52 }
 0x3b2   :  { %963 = vmatpush1.bf16.msra.mxu1 %v962_v57  ;;  %v593_v57 = vrot.slane %v732_v54, %v1223_v20 }
 0x468   :  { %v452_v17 = vpop.f32.mrb[2].mxu1 }
 0x469   :  { %v466_v23 = vmul.f32 %v739_v13, %v452_v17  ;;  %v454_v24 = vpop.f32.mrb[3].mxu1 }
 0x46a   :  { %v461_v28 = vadd.f32 %v738_v14, %v454_v24 }
 0x46b   :  { %v471_v29 = vadd.f32 %v740_v16, %v466_v23 }
 0x46c   :  { %711 = vrot.lane.b32.xlu1 %v461_v28, %s1013_s19 }
 0x46d   :  { %v472_v33 = vmax.f32 %v471_v29, 0.0 }
 0x46f   :  { %570 = vmatmul.mubr.f32.vlgmr.msra.gmra.mrb[4].mxu1 %v472_v33 }
 0x4de   :  { %v712_v8 = vpop.permute.xlu1 %711 }
 0x542   :  { %v571_v58 = vpop.f32.mrb[4].mxu1 }
 0x543   :  { %v587_v60 = vmul.f32 %v580_v55, %v571_v58  ;;  %v573_v61 = vpop.f32.mrb[5].mxu1 }
 0x544   :  { %v588_v62 = vmul.f32 %v584_v56, %v573_v61 }
 0x545   :  { %v600_v63 = vadd.f32 %v593_v57, %v587_v60 }
 0x546   :  { %v601_v0 = vadd.f32 %v597_v59, %v588_v62 }
 0x547   :  { %v602_v2 = vmax.f32 %v600_v63, 0.0 }
 0x548   :  { %v603_v1 = vmax.f32 %v601_v0, 0.0 }
 0x54a   :  { %704 = vmatprep.mubr.f32.mxu0 %v603_v1 }
 0x54b   :  { %705 = vmatmul.mubr.f32.vlgmr.msra.gmra.mrb[4].mxu0 %v602_v2 }
 0x61e   :  { %v826_v4 = vpop.f32.mrb[4].mxu0 }
 0x61f   :  { %v827_v6 = vpop.f32.mrb[5].mxu0 }
 0x620   :  { %v828_v7 = vadd.f32 %v827_v6, %v826_v4 }
 0x622   :  { %v707_v20 = vadd.f32 %v828_v7, %v741_v5 }
 0x624   :  { %v718_v9 = vsel %vm52_vm0, %v707_v20, %v712_v8 }
 0x625   :  { %v720_v10 = vsel %vm719_vm4, %v718_v9, %v716_v22 }
 0x626   :  { %v722_v27 = vsel %vm721_vm5, %v720_v10, %v716_v22 }
 0x627   :  { %v724_v11 = vsel %vm723_vm6, %v722_v27, 0.0 }
 0x628   :  { %725 = vst [vmem:[%s1507_s8] sm:$0xff] %v724_v11 }

</bundles_post_ra>
